<compile_context>
chip_gen: v7x
topology: tpu7x:2x2x1
jax: 0.10.0
libtpu: 0.0.40
codegen_flags: <defaults>
</compile_context>

<pallas_src>
import functools

import jax
import jax.numpy as jnp
from jax.experimental import pallas as pl
from jax.experimental.pallas import tpu as pltpu

_LANES = 128
_SUBLANES = 8
_ROW_GRANULE = 32                 # safe packed-tile granularity for f32/bf16/int8
_TARGET_BLOCK_BYTES = 2 << 20     # ~2 MiB per input per pipeline buffer


def _round_up(a, b):
    return ((a + b - 1) // b) * b


def _loss_terms(r, f, loss_type):
    """Per-element real/fake loss terms (f32 in, f32 out).  Shared by the
    kernel, the wrapper tail path and the reference."""
    if loss_type == "hinge":
        return jnp.maximum(1.0 - r, 0.0), jnp.maximum(1.0 + f, 0.0)
    # 'vanilla' and 'non-saturating' are algebraically identical:
    #   real term = softplus(-r) = relu(-r) + log1p(exp(-|r|))
    #   fake term = softplus( f) = relu( f) + log1p(exp(-|f|))
    real_elem = jnp.maximum(-r, 0.0) + jnp.log1p(jnp.exp(-jnp.abs(r)))
    fake_elem = jnp.maximum(f, 0.0) + jnp.log1p(jnp.exp(-jnp.abs(f)))
    return real_elem, fake_elem


def _disc_loss_kernel(real_ref, fake_ref, out_ref, *, loss_type, total_rows,
                      block_rows, needs_mask):
    """Per grid step writes 4 lane-dense partial-sum vectors of shape (1, 128):
         out[i, 0] = block partial sum of per-element real loss
         out[i, 1] = block partial sum of per-element fake loss
         out[i, 2] = block partial sum of real logits   (for LeCam mean)
         out[i, 3] = block partial sum of fake logits   (for LeCam mean)
    """
    i = pl.program_id(0)

    r = real_ref[...].astype(jnp.float32)
    f = fake_ref[...].astype(jnp.float32)
    real_elem, fake_elem = _loss_terms(r, f, loss_type)

    if needs_mask:
        # Only compiled in when total_rows % block_rows != 0.  Per-block
        # residual compare (no global-index multiply -> no int32 overflow);
        # pure VPU filler while the DMA streams, no mask array from HBM.
        rows_left = total_rows - i * block_rows
        row = jax.lax.broadcasted_iota(jnp.int32, (block_rows, _LANES), 0)
        valid = row < rows_left
        zero = jnp.zeros_like(r)
        real_elem = jnp.where(valid, real_elem, zero)
        fake_elem = jnp.where(valid, fake_elem, zero)
        r = jnp.where(valid, r, zero)
        f = jnp.where(valid, f, zero)

    def _partial(x):
        # Tile-preserving reshape + VPU adds down to (8,128), then a single
        # cross-sublane reduce (XLU slot is idle in this kernel) to (1,128).
        if block_rows > _SUBLANES and block_rows % _SUBLANES == 0:
            x = x.reshape(block_rows // _SUBLANES, _SUBLANES, _LANES).sum(axis=0)
        return x.sum(axis=0, keepdims=True)

    out_ref[0, 0] = _partial(real_elem)
    out_ref[0, 1] = _partial(fake_elem)
    out_ref[0, 2] = _partial(r)
    out_ref[0, 3] = _partial(f)


def _disc_loss_sums(real_logits, fake_logits, loss_type):
    """Returns (sums, n) where sums = [sum real_loss, sum fake_loss,
    sum real_logits, sum fake_logits] (f32) and n is the element count."""
    assert real_logits.shape == fake_logits.shape
    real_flat = real_logits.reshape(-1)
    fake_flat = fake_logits.reshape(-1)
    n = real_flat.shape[0]
    n_main = (n // _LANES) * _LANES
    rows = n_main // _LANES

    sums = jnp.zeros((4,), jnp.float32)

    if rows > 0:
        if n_main == n:
            # Free bitcast reshape, no HBM copy.
            real2d = real_flat.reshape(rows, _LANES)
            fake2d = fake_flat.reshape(rows, _LANES)
        else:
            # Rare misaligned case: stream the aligned prefix; the <128-element
            # remainder is reduced below in plain JAX.
            real2d = real_flat[:n_main].reshape(rows, _LANES)
            fake2d = fake_flat[:n_main].reshape(rows, _LANES)

        itemsize = jnp.dtype(real2d.dtype).itemsize
        # ~2 MiB per input per buffer: 4096 rows f32, 8192 rows bf16, ...
        max_rows = max(_ROW_GRANULE, _TARGET_BLOCK_BYTES // (_LANES * itemsize))
        if rows <= _ROW_GRANULE:
            block_rows = rows            # block dim == full array dim (always legal)
        else:
            # >=2 grid steps so the "parallel" axis feeds both v7x TensorCores.
            block_rows = min(max_rows, _round_up(pl.cdiv(rows, 2), _ROW_GRANULE))
        num_blocks = pl.cdiv(rows, block_rows)
        needs_mask = (rows % block_rows) != 0

        transcendentals = 0 if loss_type == "hinge" else 4 * n_main
        cost = pl.CostEstimate(
            flops=10 * n_main,
            transcendentals=transcendentals,
            bytes_accessed=(2 * n_main * itemsize
                            + num_blocks * 4 * _LANES * 4),
        )

        partials = pl.pallas_call(
            functools.partial(_disc_loss_kernel, loss_type=loss_type,
                              total_rows=rows, block_rows=block_rows,
                              needs_mask=needs_mask),
            out_shape=jax.ShapeDtypeStruct((num_blocks, 4, 1, _LANES),
                                           jnp.float32),
            grid=(num_blocks,),
            in_specs=[
                pl.BlockSpec((block_rows, _LANES), lambda i: (i, 0)),
                pl.BlockSpec((block_rows, _LANES), lambda i: (i, 0)),
            ],
            out_specs=pl.BlockSpec((1, 4, 1, _LANES),
                                   lambda i: (i, 0, 0, 0)),
            compiler_params=pltpu.CompilerParams(
                dimension_semantics=("parallel",)),
            cost_estimate=cost,
        )(real2d, fake2d)

        sums = partials.sum(axis=(0, 2, 3))      # (4,) f32

    if n_main != n:
        # Sub-128-element remainder: trivial plain-JAX reduction.
        r_tail = real_flat[n_main:].astype(jnp.float32)
        f_tail = fake_flat[n_main:].astype(jnp.float32)
        re_t, fe_t = _loss_terms(r_tail, f_tail, loss_type)
        sums = sums + jnp.stack(
            [re_t.sum(), fe_t.sum(), r_tail.sum(), f_tail.sum()])

    return sums, n


class DiscriminatorLoss:
    """JAX/Pallas port of the PyTorch DiscriminatorLoss module (forward only)."""

    def __init__(self, discriminator_factor=1.0, discriminator_start=50001,
                 discriminator_loss_type="non-saturating",
                 lecam_loss_weight=None, gradient_penalty_loss_weight=None):
        assert discriminator_loss_type in ["hinge", "vanilla", "non-saturating"]
        self.discriminator_factor = discriminator_factor
        self.discriminator_start = discriminator_start
        self.discriminator_loss_type = discriminator_loss_type
        self.lecam_loss_weight = lecam_loss_weight
        self.gradient_penalty_loss_weight = gradient_penalty_loss_weight

    def __call__(self, real_logits, fake_logits, global_step,
                 lecam_ema_real=None, lecam_ema_fake=None, real_video=None,
                 split="train"):
        sums, n = _disc_loss_sums(real_logits, fake_logits,
                                  self.discriminator_loss_type)
        inv_n = 1.0 / float(n)
        mean_real_loss = sums[0] * inv_n
        mean_fake_loss = sums[1] * inv_n
        real_pred = sums[2] * inv_n
        fake_pred = sums[3] * inv_n

        # --- adversarial term -------------------------------------------------
        if self.discriminator_factor is not None and self.discriminator_factor > 0.0:
            if isinstance(global_step, (int, float)):
                # adopt_weight: static gate on a host-side step counter
                disc_factor = (self.discriminator_factor
                               if global_step >= self.discriminator_start else 0.0)
            else:
                # traced step counter: keep the gate on-device
                disc_factor = jnp.where(
                    global_step >= self.discriminator_start,
                    jnp.float32(self.discriminator_factor), jnp.float32(0.0))
            disc_loss = 0.5 * (mean_real_loss + mean_fake_loss)
            weighted_d_adversarial_loss = disc_factor * disc_loss
        else:
            weighted_d_adversarial_loss = jnp.float32(0.0)

        # --- LeCam regularizer (scalar math on kernel-reduced means) ----------
        lecam_loss = jnp.float32(0.0)
        if self.lecam_loss_weight is not None and self.lecam_loss_weight > 0.0:
            lecam_loss = (jnp.maximum(real_pred - lecam_ema_fake, 0.0) ** 2
                          + jnp.maximum(lecam_ema_real - fake_pred, 0.0) ** 2)
            lecam_loss = lecam_loss * self.lecam_loss_weight

        # --- gradient penalty -------------------------------------------------
        gradient_penalty = jnp.float32(0.0)
        if (self.gradient_penalty_loss_weight is not None
                and self.gradient_penalty_loss_weight > 0.0):
            # TODO(synk): gradient_penalty_fn needs autodiff of real_logits w.r.t.
            # real_video through the external discriminator network, which is not
            # part of this module's compute graph; no clean Pallas equivalent.
            gradient_penalty = jnp.float32(0.0)

        return (jnp.asarray(weighted_d_adversarial_loss, jnp.float32),
                jnp.asarray(lecam_loss, jnp.float32),
                jnp.asarray(gradient_penalty, jnp.float32))


# ---------------------------------------------------------------------------
# pure-JAX reference (mirrors the PyTorch math) for a sanity check
def _ref_forward(real, fake, loss_type, disc_factor, lecam_w, ema_r, ema_f):
    r = real.astype(jnp.float32)
    f = fake.astype(jnp.float32)
    if loss_type == "hinge":
        re = jnp.maximum(1.0 - r, 0.0)
        fe = jnp.maximum(1.0 + f, 0.0)
    elif loss_type == "vanilla":
        re = jax.nn.softplus(-r)
        fe = jax.nn.softplus(f)
    else:  # non-saturating: sigmoid CE with labels ones / zeros
        re = jnp.maximum(r, 0.0) - r + jnp.log1p(jnp.exp(-jnp.abs(r)))
        fe = jnp.maximum(f, 0.0) + jnp.log1p(jnp.exp(-jnp.abs(f)))
    adv = disc_factor * 0.5 * (re.mean() + fe.mean())
    lec = jnp.float32(0.0)
    if lecam_w:
        lec = lecam_w * (jnp.maximum(r.mean() - ema_f, 0.0) ** 2
                         + jnp.maximum(ema_r - f.mean(), 0.0) ** 2)
    return jnp.float32(adv), jnp.float32(lec)


def _check_case(shape, dtype, loss_type, key, lecam_w, ema_r, ema_f,
                global_step, disc_start):
    k1, k2 = jax.random.split(key)
    real_logits = jax.random.normal(k1, shape, dtype)
    fake_logits = jax.random.normal(k2, shape, dtype) - jnp.asarray(0.5, dtype)

    mod = DiscriminatorLoss(discriminator_factor=1.0,
                            discriminator_start=disc_start,
                            discriminator_loss_type=loss_type,
                            lecam_loss_weight=lecam_w,
                            gradient_penalty_loss_weight=None)
    adv, lecam, gp = mod(real_logits, fake_logits, global_step,
                         lecam_ema_real=ema_r, lecam_ema_fake=ema_f)
    adv, lecam, gp = jax.block_until_ready((adv, lecam, gp))

    disc_factor = 1.0 if global_step >= disc_start else 0.0
    ref_adv, ref_lecam = _ref_forward(real_logits, fake_logits, loss_type,
                                      disc_factor, lecam_w, ema_r, ema_f)
    assert jnp.allclose(adv, ref_adv, rtol=1e-4, atol=1e-6), (loss_type, adv, ref_adv)
    assert jnp.allclose(lecam, ref_lecam, rtol=1e-4, atol=1e-6), (loss_type, lecam, ref_lecam)
    assert float(gp) == 0.0


if __name__ == "__main__":
    key = jax.random.PRNGKey(0)
    k_a, k_b, k_c, k_d = jax.random.split(key, 4)

    ema_r = jnp.float32(0.3)
    ema_f = jnp.float32(-0.3)

    # PatchGAN-style logits (NCHW), 128-aligned element count, single tiny block
    _check_case((2, 1, 16, 16), jnp.float32, "non-saturating", k_a, 0.01,
                ema_r, ema_f, global_step=60000, disc_start=50001)
    # misaligned element count (exercises in-kernel row mask + JAX tail), hinge
    _check_case((2, 4, 30, 30), jnp.float32, "hinge", k_b, 0.01,
                ema_r, ema_f, global_step=60000, disc_start=50001)
    # bf16 logits, vanilla loss, 2 grid steps, no mask needed
    _check_case((2, 3, 64, 64), jnp.bfloat16, "vanilla", k_c, 0.01,
                ema_r, ema_f, global_step=60000, disc_start=50001)
    # step before discriminator_start (adopt_weight gate -> 0 adversarial term)
    _check_case((2, 4, 30, 30), jnp.float32, "hinge", k_d, 0.01,
                ema_r, ema_f, global_step=100, disc_start=50001)

    print("KERNEL_OK")
</pallas_src>

<mosaic_0001>
module attributes {stable_mosaic.version = 11 : i64} {
  func.func @_disc_loss_kernel(%arg0: i32, %arg1: memref<4x128xf32, #tpu.memory_space<vmem>>, %arg2: memref<4x128xf32, #tpu.memory_space<vmem>>, %arg3: memref<1x4x1x128xf32, #tpu.memory_space<vmem>>) attributes {dimension_semantics = [#tpu.dimension_semantics<parallel>], iteration_bounds = array<i64: 1>, scalar_prefetch = 0 : i64, scratch_operands = 0 : i64, tpu.core_type = #tpu.core_type<tc>, window_params = [{transform_indices = @transform_0, window_bounds = array<i64: 4, 128>}, {transform_indices = @transform_1, window_bounds = array<i64: 4, 128>}, {transform_indices = @transform_2, window_bounds = array<i64: 1, 4, 1, 128>}]} {
    %c0 = arith.constant 0 : index
    %c0_0 = arith.constant 0 : index
    %0 = vector.load %arg1[%c0, %c0_0] : memref<4x128xf32, #tpu.memory_space<vmem>>, vector<4x128xf32>
    %c0_1 = arith.constant 0 : index
    %c0_2 = arith.constant 0 : index
    %1 = vector.load %arg2[%c0_1, %c0_2] : memref<4x128xf32, #tpu.memory_space<vmem>>, vector<4x128xf32>
    %cst = arith.constant 0.000000e+00 : f32
    %2 = vector.broadcast %cst : f32 to vector<4x128xf32>
    %3 = arith.subf %2, %0 : vector<4x128xf32>
    %cst_3 = arith.constant 0.000000e+00 : f32
    %4 = vector.broadcast %cst_3 : f32 to vector<4x128xf32>
    %5 = arith.maximumf %3, %4 : vector<4x128xf32>
    %6 = math.absf %0 : vector<4x128xf32>
    %cst_4 = arith.constant 0.000000e+00 : f32
    %7 = vector.broadcast %cst_4 : f32 to vector<4x128xf32>
    %8 = arith.subf %7, %6 : vector<4x128xf32>
    %9 = math.exp %8 : vector<4x128xf32>
    %10 = math.log1p %9 : vector<4x128xf32>
    %11 = arith.addf %5, %10 : vector<4x128xf32>
    %cst_5 = arith.constant 0.000000e+00 : f32
    %12 = vector.broadcast %cst_5 : f32 to vector<4x128xf32>
    %13 = arith.maximumf %1, %12 : vector<4x128xf32>
    %14 = math.absf %1 : vector<4x128xf32>
    %cst_6 = arith.constant 0.000000e+00 : f32
    %15 = vector.broadcast %cst_6 : f32 to vector<4x128xf32>
    %16 = arith.subf %15, %14 : vector<4x128xf32>
    %17 = math.exp %16 : vector<4x128xf32>
    %18 = math.log1p %17 : vector<4x128xf32>
    %19 = arith.addf %13, %18 : vector<4x128xf32>
    %cst_7 = arith.constant dense<0.000000e+00> : vector<128xf32>
    %20 = vector.multi_reduction <add>, %11, %cst_7 [0] : vector<4x128xf32> to vector<128xf32>
    %21 = vector.shape_cast %20 : vector<128xf32> to vector<1x128xf32>
    %c0_8 = arith.constant 0 : index
    %c0_9 = arith.constant 0 : index
    %c0_10 = arith.constant 0 : index
    %c0_11 = arith.constant 0 : index
    %22 = vector.load %arg3[%c0_8, %c0_9, %c0_10, %c0_11] : memref<1x4x1x128xf32, #tpu.memory_space<vmem>>, vector<1x1x1x128xf32>
    %23 = vector.shape_cast %22 : vector<1x1x1x128xf32> to vector<1x128xf32>
    %24 = vector.shape_cast %21 : vector<1x128xf32> to vector<1x1x1x128xf32>
    tpu.vector_store %arg3[%c0_8, %c0_9, %c0_10, %c0_11], %24 {strides = array<i32>} : memref<1x4x1x128xf32, #tpu.memory_space<vmem>>, vector<1x1x1x128xf32>,
    %cst_12 = arith.constant dense<0.000000e+00> : vector<128xf32>
    %25 = vector.multi_reduction <add>, %19, %cst_12 [0] : vector<4x128xf32> to vector<128xf32>
    %26 = vector.shape_cast %25 : vector<128xf32> to vector<1x128xf32>
    %c0_13 = arith.constant 0 : index
    %c1 = arith.constant 1 : index
    %c0_14 = arith.constant 0 : index
    %c0_15 = arith.constant 0 : index
    %27 = vector.load %arg3[%c0_13, %c1, %c0_14, %c0_15] : memref<1x4x1x128xf32, #tpu.memory_space<vmem>>, vector<1x1x1x128xf32>
    %28 = vector.shape_cast %27 : vector<1x1x1x128xf32> to vector<1x128xf32>
    %29 = vector.shape_cast %26 : vector<1x128xf32> to vector<1x1x1x128xf32>
    tpu.vector_store %arg3[%c0_13, %c1, %c0_14, %c0_15], %29 {strides = array<i32>} : memref<1x4x1x128xf32, #tpu.memory_space<vmem>>, vector<1x1x1x128xf32>,
    %cst_16 = arith.constant dense<0.000000e+00> : vector<128xf32>
    %30 = vector.multi_reduction <add>, %0, %cst_16 [0] : vector<4x128xf32> to vector<128xf32>
    %31 = vector.shape_cast %30 : vector<128xf32> to vector<1x128xf32>
    %c0_17 = arith.constant 0 : index
    %c2 = arith.constant 2 : index
    %c0_18 = arith.constant 0 : index
    %c0_19 = arith.constant 0 : index
    %32 = vector.load %arg3[%c0_17, %c2, %c0_18, %c0_19] : memref<1x4x1x128xf32, #tpu.memory_space<vmem>>, vector<1x1x1x128xf32>
    %33 = vector.shape_cast %32 : vector<1x1x1x128xf32> to vector<1x128xf32>
    %34 = vector.shape_cast %31 : vector<1x128xf32> to vector<1x1x1x128xf32>
    tpu.vector_store %arg3[%c0_17, %c2, %c0_18, %c0_19], %34 {strides = array<i32>} : memref<1x4x1x128xf32, #tpu.memory_space<vmem>>, vector<1x1x1x128xf32>,
    %cst_20 = arith.constant dense<0.000000e+00> : vector<128xf32>
    %35 = vector.multi_reduction <add>, %1, %cst_20 [0] : vector<4x128xf32> to vector<128xf32>
    %36 = vector.shape_cast %35 : vector<128xf32> to vector<1x128xf32>
    %c0_21 = arith.constant 0 : index
    %c3 = arith.constant 3 : index
    %c0_22 = arith.constant 0 : index
    %c0_23 = arith.constant 0 : index
    %37 = vector.load %arg3[%c0_21, %c3, %c0_22, %c0_23] : memref<1x4x1x128xf32, #tpu.memory_space<vmem>>, vector<1x1x1x128xf32>
    %38 = vector.shape_cast %37 : vector<1x1x1x128xf32> to vector<1x128xf32>
    %39 = vector.shape_cast %36 : vector<1x128xf32> to vector<1x1x1x128xf32>
    tpu.vector_store %arg3[%c0_21, %c3, %c0_22, %c0_23], %39 {strides = array<i32>} : memref<1x4x1x128xf32, #tpu.memory_space<vmem>>, vector<1x1x1x128xf32>,
    return
  }
  func.func @transform_0(%arg0: i32) -> (i32, i32) {
    %c0_i32 = arith.constant 0 : i32
    %c0_i32_0 = arith.constant 0 : i32
    return %arg0, %c0_i32 : i32, i32
  }
  func.func @transform_1(%arg0: i32) -> (i32, i32) {
    %c0_i32 = arith.constant 0 : i32
    %c0_i32_0 = arith.constant 0 : i32
    return %arg0, %c0_i32 : i32, i32
  }
  func.func @transform_2(%arg0: i32) -> (i32, i32, i32, i32) {
    %c0_i32 = arith.constant 0 : i32
    %c0_i32_0 = arith.constant 0 : i32
    %c0_i32_1 = arith.constant 0 : i32
    %c0_i32_2 = arith.constant 0 : i32
    return %arg0, %c0_i32, %c0_i32_0, %c0_i32_1 : i32, i32, i32, i32
  }
}

</mosaic_0001>

<bundles_post_ra>
// kernel: tpu_custom_call.1
= control target key start
LH: loop header
LB: loop body
LE: loop exit
PB: predicated region body
PF: predicated region fallthrough
CT: control target
= control target key end

     0   :  { %7 = vsyncpa [#allocation3], 0  ;;  %s268_s0 = inlined_call_operand.hbm [shape: f32[4,128], index: 0, kind: input, shape index: {}]   ;;  %s269_s1 = inlined_call_operand.hbm [shape: f32[4,128], index: 1, kind: input, shape index: {}]   ;;  %s270_s2 = inlined_call_operand.hbm [shape: f32[1,4,1,128], index: 2, kind: output, shape index: {}]  }
   0x1   :  { %8 = vsyncpa [#allocation6], 0 }
   0x2   :  { %9 = vsyncpa [#allocation4], 0  ;;  %s208_s9 = smov [#allocation2]   ;;  %s209_s11 = smov [#allocation5]  }
   0x3   :  { %s16_s10 = sshll.u32 %s208_s9, 4  ;;  %s26_s12 = sshll.u32 %s209_s11, 4  ;;  %s17_s10 = int_to_ptr.vmem [resolvable:$true] %s16_s10  ;;  %s27_s12 = int_to_ptr.vmem [resolvable:$true] %s26_s12 }
   0x4   :  { %s136_s15 = scalar_lea.hbm %s268_s0, 64 }
   0x5   :  { %p137_p0 = scmp.ne.s32.totalorder %s268_s0, %s136_s15  ;;  %p140_p1 = scmp.lt.u32.totalorder %s136_s15, %s268_s0 }
   0x7   :  { %p142_p2 = pnand %p140_p1, %p137_p0 }
   0x9   :  { %145 = shalt.err (!%p142_p2)
}
   0xa   :  { %s146_s20 = scalar_lea.vmem %s17_s10, 64  ;;  %p151_p4 = scmp.lt.s32.totalorder %s17_s10, %s17_s10 }
   0xb   :  { %p147_p3 = scmp.ne.s32.totalorder %s17_s10, %s146_s20  ;;  %p152_p5 = scmp.lt.s32.totalorder %s146_s20, %s146_s20 }
   0xd   :  { %p153_p6 = por %p152_p5, %p151_p4 }
   0xf   :  { %p154_p7 = pnand %p153_p6, %p147_p3 }
  0x11   :  { %157 = shalt.err (!%p154_p7)
}
  0x12   :  { %19 = dma.hbm_to_vmem [thread:$0]  %s268_s0, 64, %s17_s10, [#allocation3]  }
  0x13   :  { %s158_s25 = scalar_lea.hbm %s269_s1, 64 }
  0x14   :  { %p159_p8 = scmp.ne.s32.totalorder %s269_s1, %s158_s25  ;;  %p162_p9 = scmp.lt.u32.totalorder %s158_s25, %s269_s1 }
  0x16   :  { %p164_p10 = pnand %p162_p9, %p159_p8 }
  0x18   :  { %167 = shalt.err (!%p164_p10)
}
  0x19   :  { %s168_s30 = scalar_lea.vmem %s27_s12, 64  ;;  %p173_p12 = scmp.lt.s32.totalorder %s27_s12, %s27_s12 }
  0x1a   :  { %p169_p11 = scmp.ne.s32.totalorder %s27_s12, %s168_s30  ;;  %p174_p13 = scmp.lt.s32.totalorder %s168_s30, %s168_s30 }
  0x1c   :  { %p175_p0 = por %p174_p13, %p173_p12 }
  0x1e   :  { %p176_p1 = pnand %p175_p0, %p169_p11 }
  0x20   :  { %179 = shalt.err (!%p176_p1)
}
  0x21   :  { %29 = dma.hbm_to_vmem [thread:$0]  %s269_s1, 64, %s27_s12, [#allocation6]  }
  0x22   :  { %202 = dma.done.wait [#allocation3], 64  }
  0x23   :  { %203 = vsyncadd [#allocation3], 4294967232 }
  0x24   :  { %204 = dma.done.wait [#allocation6], 64  }
  0x25   :  { %205 = vsyncadd [#allocation6], 4294967232  ;;  %vm69_vm0 = vcmask 1043456   ;;  %v36_v0 = vld [vmem:[#allocation2] sm:$0xf]  ;;  %s210_s1 = smov [#allocation7]  }
  0x26   :  { %v37_v1 = vld [vmem:[#allocation5] sm:$0xf]  ;;  %v40_v2 = vand.u32 2147483647, %v36_v0  ;;  %v87_v4 = vsel %vm69_vm0, %v36_v0, 0.0  ;;  %v38_v29 = vsub.f32 0.0, %v36_v0 }
  0x27   :  { %v55_v3 = vand.u32 2147483647, %v37_v1  ;;  %v96_v5 = vsel %vm69_vm0, %v37_v1, 0.0  ;;  %v88_v8 = vrot.slane %v87_v4, 4  ;;  %v54_v39 = vmax.f32 %v37_v1, 0.0  ;;  %s110_s4 = sshll.u32 %s210_s1, 4  ;;  %s111_s4 = int_to_ptr.vmem [resolvable:$true] %s110_s4 }
  0x28   :  { %v41_v6 = vsub.f32 0.0, %v40_v2  ;;  %v97_v9 = vrot.slane %v96_v5, 4  ;;  %v39_v35 = vmax.f32 %v38_v29, 0.0  ;;  %s180_s5 = scalar_lea.vmem %s111_s4, 64  ;;  %p185_p3 = scmp.lt.s32.totalorder %s111_s4, %s111_s4 }
  0x29   :  { %v56_v7 = vsub.f32 0.0, %v55_v3  ;;  %v89_v12 = vadd.f32 %v88_v8, %v87_v4  ;;  %p181_p2 = scmp.ne.s32.totalorder %s111_s4, %s180_s5  ;;  %p186_p4 = scmp.lt.s32.totalorder %s180_s5, %s180_s5 }
  0x2a   :  { %v42_v10 = vmul.f32 1.442695, %v41_v6  ;;  %v98_v13 = vadd.f32 %v97_v9, %v96_v5 }
  0x2b   :  { %v57_v11 = vmul.f32 1.442695, %v56_v7  ;;  %v90_v14 = vrot.slane %v89_v12, 2  ;;  %p187_p5 = por %p186_p4, %p185_p3 }
  0x2c   :  { %128 = vpow2.f32 %v42_v10  ;;  %v99_v15 = vrot.slane %v98_v13, 2 }
  0x2d   :  { %130 = vpow2.f32 %v57_v11  ;;  %v91_v16 = vadd.f32 %v90_v14, %v89_v12  ;;  %p188_p6 = pnand %p187_p5, %p181_p2 }
  0x2e   :  { %v100_v17 = vadd.f32 %v99_v15, %v98_v13 }
  0x2f   :  { %v92_v18 = vrot.slane %v91_v16, 1 }
  0x30   :  { %v101_v19 = vrot.slane %v100_v17, 1 }
  0x31   :  { %v93_v20 = vadd.f32 %v92_v18, %v91_v16 }
  0x32   :  { %v102_v21 = vadd.f32 %v101_v19, %v100_v17 }
  0x33   :  { %95 = vst [vmem:[#allocation7 + $0x2] sm:$0x1] %v93_v20 }
  0x34   :  { %104 = vst [vmem:[#allocation7 + $0x3] sm:$0x1] %v102_v21 }
  0x36   :  { %v129_v22 = vpop.eup %128 }
  0x37   :  { %v131_v23 = vpop.eup %130  ;;  %v44_v24 = vadd.f32 1.0, %v129_v22  ;;  %v47_v26 = vmul.f32 -0.5, %v129_v22  ;;  %v50_v30 = vand.u32 2147483647, %v129_v22 }
  0x38   :  { %v59_v25 = vadd.f32 1.0, %v131_v23  ;;  %v62_v27 = vmul.f32 -0.5, %v131_v23  ;;  %v65_v32 = vand.u32 2147483647, %v131_v23 }
  0x39   :  { %132 = vlog2.f32 %v44_v24  ;;  %v48_v28 = vadd.f32 1.0, %v47_v26  ;;  %vm51_vm1 = vcmp.lt.f32.partialorder %v50_v30, 0.0004427343 }
  0x3a   :  { %134 = vlog2.f32 %v59_v25  ;;  %v63_v31 = vadd.f32 1.0, %v62_v27  ;;  %vm66_vm2 = vcmp.lt.f32.partialorder %v65_v32, 0.0004427343 }
  0x3b   :  { %v49_v33 = vmul.f32 %v129_v22, %v48_v28 }
  0x3c   :  { %v64_v36 = vmul.f32 %v131_v23, %v63_v31 }
  0x43   :  { %v133_v34 = vpop.eup %132 }
  0x44   :  { %v135_v37 = vpop.eup %134  ;;  %v46_v38 = vmul.f32 0.6931472, %v133_v34 }
  0x45   :  { %v61_v40 = vmul.f32 0.6931472, %v135_v37 }
  0x46   :  { %v52_v41 = vsel %vm51_vm1, %v49_v33, %v46_v38 }
  0x47   :  { %v53_v42 = vadd.f32 %v52_v41, %v39_v35  ;;  %v67_v43 = vsel %vm66_vm2, %v64_v36, %v61_v40 }
  0x48   :  { %v68_v44 = vadd.f32 %v67_v43, %v54_v39 }
  0x49   :  { %v70_v45 = vsel %vm69_vm0, %v53_v42, 0.0 }
  0x4a   :  { %v71_v46 = vrot.slane %v70_v45, 4  ;;  %v78_v47 = vsel %vm69_vm0, %v68_v44, 0.0 }
  0x4b   :  { %v79_v48 = vrot.slane %v78_v47, 4 }
  0x4c   :  { %v72_v49 = vadd.f32 %v71_v46, %v70_v45 }
  0x4d   :  { %v80_v50 = vadd.f32 %v79_v48, %v78_v47 }
  0x4e   :  { %v73_v51 = vrot.slane %v72_v49, 2 }
  0x4f   :  { %v81_v52 = vrot.slane %v80_v50, 2 }
  0x50   :  { %v74_v53 = vadd.f32 %v73_v51, %v72_v49 }
  0x51   :  { %v82_v54 = vadd.f32 %v81_v52, %v80_v50 }
  0x52   :  { %v75_v55 = vrot.slane %v74_v53, 1 }
  0x53   :  { %v83_v56 = vrot.slane %v82_v54, 1 }
  0x54   :  { %v76_v57 = vadd.f32 %v75_v55, %v74_v53 }
  0x55   :  { %v84_v58 = vadd.f32 %v83_v56, %v82_v54 }
  0x56   :  { %77 = vst [vmem:[#allocation7] sm:$0x1] %v76_v57 }
  0x57   :  { %86 = vst [vmem:[#allocation7 + $0x1] sm:$0x1] %v84_v58 }
  0x58   :  { %191 = shalt.err (!%p188_p6)
}
  0x59   :  { %s192_s8 = scalar_lea.hbm %s270_s2, 64 }
  0x5a   :  { %p193_p7 = scmp.ne.s32.totalorder %s270_s2, %s192_s8  ;;  %p196_p8 = scmp.lt.u32.totalorder %s192_s8, %s270_s2 }
  0x5c   :  { %p198_p9 = pnand %p196_p8, %p193_p7 }
  0x5e   :  { %201 = shalt.err (!%p198_p9)
}
  0x5f   :  { %s211_s13 = smov 16   ;;  %s212_s14 = smov 1  }
  0x60   :  { %116 = dma.vmem_to_hbm [thread:$0]  %s111_s4, 64, %s270_s2, [#allocation4], %s211_s13, %s211_s13, %s212_s14  }
  0x61   :  { %206 = dma.done.wait [#allocation4], 64  }
  0x62   :  { %207 = vsyncadd [#allocation4], 4294967232 }
  0x63   :  { %120 = vsyncpa [#allocation3], 1 }
  0x64   :  { %121 = vsyncpa [#allocation6], 1 }
  0x65   :  { %122 = vsyncpa [#allocation4], 1 }

</bundles_post_ra>
